<compile_context>
chip_gen: v7x
topology: tpu7x:2x2x1
jax: 0.10.0
libtpu: 0.0.40
codegen_flags: <defaults>
</compile_context>

<pallas_src>
import functools

import jax
import jax.numpy as jnp
from jax.experimental import pallas as pl
from jax.experimental.pallas import tpu as pltpu


def _round_up(x, m):
    return -(-x // m) * m


def _tile_lanes(hw, max_lanes=2048):
    """Largest lane tile (multiple of 128, <= max_lanes) dividing the
    128-rounded spatial size, so padding never exceeds the 128 rounding."""
    hwp = _round_up(hw, 128)
    q = hwp // 128
    best = 1
    for cand in range(1, min(q, max_lanes // 128) + 1):
        if q % cand == 0:
            best = cand
    return 128 * best, hwp


# ----------------------------- Pallas kernel --------------------------------
def _up_matmul_kernel(w_ref, x_ref, b_ref, o_ref):
    # w_ref: (Nc, Cin)  invariant across the grid (constant index_map)
    # x_ref: (Cin, tm)  activations for one batch element, spatial on lanes
    # b_ref: (Nc, 1)    per-row (tap, out-channel) bias, fused epilogue add
    # o_ref: (Nc, tm)   lane-dense output tile (tm % 128 == 0 -> unmasked vst)
    acc = jnp.dot(w_ref[...], x_ref[...], preferred_element_type=jnp.float32)
    o_ref[...] = (acc + b_ref[...]).astype(o_ref.dtype)


def _pallas_up_matmul(wT, x3, brow, *, tm):
    Nc, Cin = wT.shape
    N, _, HWp = x3.shape
    assert HWp % tm == 0 and tm % 128 == 0
    return pl.pallas_call(
        _up_matmul_kernel,
        out_shape=jax.ShapeDtypeStruct((N, Nc, HWp), jnp.float32),
        grid_spec=pltpu.PrefetchScalarGridSpec(
            num_scalar_prefetch=0,
            grid=(N, HWp // tm),
            in_specs=[
                pl.BlockSpec((Nc, Cin), lambda n, i: (0, 0)),       # weight (resident)
                pl.BlockSpec((None, Cin, tm), lambda n, i: (n, 0, i)),  # x (per batch)
                pl.BlockSpec((Nc, 1), lambda n, i: (0, 0)),         # bias (resident)
            ],
            out_specs=pl.BlockSpec((None, Nc, tm), lambda n, i: (n, 0, i)),
        ),
        compiler_params=pltpu.CompilerParams(
            dimension_semantics=("parallel", "parallel"),
        ),
    )(wT, x3, brow)


# ------------------------------ Up (forward) ---------------------------------
def up_forward(x_nchw, weight, bias, *, stride, padding):
    """ConvTranspose2d forward, matching torch.nn.ConvTranspose2d semantics.

    x_nchw : (N, Cin, H, W)
    weight : (Cin, Cout, kH, kW)   (PyTorch ConvTranspose2d layout)
    bias   : (Cout,)
    """
    N, Cin, H, W = x_nchw.shape
    _, Cout, kH, kW = weight.shape
    s, p = stride, padding
    Nc = kH * kW * Cout
    HW = H * W

    # Non-overlapping fast path: taps never collide -> pure reshape, no scatter.
    fast = (p == 0 and s == kH and s == kW)

    # Pure reshape (no relayout): x (N, Cin, H, W) -> (N, Cin, H*W).
    x3 = x_nchw.reshape(N, Cin, HW).astype(jnp.float32)
    # weight -> (kH*kW*Cout, Cin), row order (kh, kw, co).
    wT = jnp.transpose(weight, (2, 3, 1, 0)).reshape(Nc, Cin).astype(jnp.float32)

    tm, HWp = _tile_lanes(HW)
    if HWp != HW:
        x3 = jnp.pad(x3, ((0, 0), (0, 0), (0, HWp - HW)))

    if fast:
        # Each output element is produced by exactly one tap -> fuse bias here.
        brow = jnp.tile(bias.astype(jnp.float32), kH * kW).reshape(Nc, 1)
    else:
        brow = jnp.zeros((Nc, 1), jnp.float32)  # bias added once after scatter

    y = _pallas_up_matmul(wT, x3, brow, tm=tm)          # (N, Nc, HWp)
    y = y[:, :, :HW]
    y6 = y.reshape(N, kH, kW, Cout, H, W)

    if fast:
        # (N,kH,kW,Cout,H,W) -> (N,Cout,H,kH,W,kW) -> (N,Cout,H*kH,W*kW)
        out = jnp.transpose(y6, (0, 3, 4, 1, 5, 2)).reshape(
            N, Cout, H * kH, W * kW)
        return out

    # General (overlapping-stride) path: XLA strided scatter-add glue.
    # TODO(synk): overlapping-tap accumulation stays in XLA glue; no clean
    # single-pass Pallas scatter for s < k without a custom DMA scheme.
    Hf = (H - 1) * s + kH
    Wf = (W - 1) * s + kW
    y_full = jnp.zeros((N, Cout, Hf, Wf), jnp.float32)
    for kh in range(kH):
        for kw in range(kW):
            y_full = y_full.at[:, :, kh:kh + s * H:s, kw:kw + s * W:s].add(
                y6[:, kh, kw])
    Hout = (H - 1) * s - 2 * p + kH
    Wout = (W - 1) * s - 2 * p + kW
    out = y_full[:, :, p:p + Hout, p:p + Wout] + bias[None, :, None, None]
    return out


# ------------------------------ reference ------------------------------------
def up_reference(x_nchw, weight, bias, *, stride, padding):
    """Pure-JAX reference via conv_general_dilated (transposed conv identity)."""
    Cin, Cout, kH, kW = weight.shape
    w_flip = jnp.transpose(weight[:, :, ::-1, ::-1], (1, 0, 2, 3))
    out = jax.lax.conv_general_dilated(
        x_nchw, w_flip,
        window_strides=(1, 1),
        padding=((kH - 1 - padding, kH - 1 - padding),
                 (kW - 1 - padding, kW - 1 - padding)),
        lhs_dilation=(stride, stride),
        dimension_numbers=("NCHW", "OIHW", "NCHW"),
    )
    return out + bias[None, :, None, None]


# --------------------------------- main ---------------------------------------
if __name__ == "__main__":
    # Module config (typical upsample): Up(in=4, out=8, kernel=2, stride=2, pad=0)
    in_channels, out_channels = 4, 8
    kernel_size, stride, padding = 2, 2, 0

    key = jax.random.PRNGKey(0)
    kx, kw, kb = jax.random.split(key, 3)

    N, H, W = 2, 16, 16
    x = jax.random.normal(kx, (N, in_channels, H, W), jnp.float32)

    # Deterministic param init (PyTorch-like uniform bound).
    fan_in = in_channels * kernel_size * kernel_size
    bound = 1.0 / (fan_in ** 0.5)
    weight = jax.random.uniform(
        kw, (in_channels, out_channels, kernel_size, kernel_size),
        jnp.float32, minval=-bound, maxval=bound)
    bias = jax.random.uniform(
        kb, (out_channels,), jnp.float32, minval=-bound, maxval=bound)

    fwd = jax.jit(functools.partial(up_forward, stride=stride, padding=padding))
    out = fwd(x, weight, bias)
    out = jax.block_until_ready(out)

    ref = up_reference(x, weight, bias, stride=stride, padding=padding)
    Hout = (H - 1) * stride - 2 * padding + kernel_size
    Wout = (W - 1) * stride - 2 * padding + kernel_size
    assert out.shape == (N, out_channels, Hout, Wout)
    assert jnp.allclose(out, ref, atol=1e-4, rtol=1e-4), "mismatch vs reference"

    print("KERNEL_OK")
</pallas_src>

<mosaic_0001>
module attributes {stable_mosaic.version = 11 : i64} {
  func.func @_up_matmul_kernel(%arg0: i32, %arg1: i32, %arg2: memref<32x4xf32, #tpu.memory_space<vmem>>, %arg3: memref<1x4x256xf32, #tpu.memory_space<vmem>>, %arg4: memref<32x1xf32, #tpu.memory_space<vmem>>, %arg5: memref<1x32x256xf32, #tpu.memory_space<vmem>>) attributes {dimension_semantics = [#tpu.dimension_semantics<parallel>, #tpu.dimension_semantics<parallel>], iteration_bounds = array<i64: 2, 1>, scalar_prefetch = 0 : i64, scratch_operands = 0 : i64, tpu.core_type = #tpu.core_type<tc>, window_params = [{pipeline_mode = #tpu.pipeline_mode<synchronous>, transform_indices = @transform_0, window_bounds = array<i64: 32, 4>}, {transform_indices = @transform_1, window_bounds = array<i64: 1, 4, 256>}, {pipeline_mode = #tpu.pipeline_mode<synchronous>, transform_indices = @transform_2, window_bounds = array<i64: 32, 1>}, {transform_indices = @transform_3, window_bounds = array<i64: 1, 32, 256>}]} {
    %c0 = arith.constant 0 : index
    %c0_0 = arith.constant 0 : index
    %0 = vector.load %arg2[%c0, %c0_0] : memref<32x4xf32, #tpu.memory_space<vmem>>, vector<32x4xf32>
    %c0_1 = arith.constant 0 : index
    %c0_2 = arith.constant 0 : index
    %c0_3 = arith.constant 0 : index
    %1 = vector.load %arg3[%c0_1, %c0_2, %c0_3] : memref<1x4x256xf32, #tpu.memory_space<vmem>>, vector<1x4x256xf32>
    %2 = vector.shape_cast %1 : vector<1x4x256xf32> to vector<4x256xf32>
    %cst = arith.constant dense<0.000000e+00> : vector<32x256xf32>
    %3 = tpu.matmul %0, %2, %cst {dimension_numbers = #tpu.dot_dimension_numbers<[1], [0], [0], [1], [0, 0, 1, 1], [], []>} : vector<32x4xf32>, vector<4x256xf32>, vector<32x256xf32> -> vector<32x256xf32>
    %c0_4 = arith.constant 0 : index
    %c0_5 = arith.constant 0 : index
    %4 = vector.load %arg4[%c0_4, %c0_5] : memref<32x1xf32, #tpu.memory_space<vmem>>, vector<32x1xf32>
    %5 = vector.broadcast %4 : vector<32x1xf32> to vector<32x256xf32>
    %6 = arith.addf %3, %5 : vector<32x256xf32>
    %c0_6 = arith.constant 0 : index
    %c0_7 = arith.constant 0 : index
    %c0_8 = arith.constant 0 : index
    %7 = vector.load %arg5[%c0_6, %c0_7, %c0_8] : memref<1x32x256xf32, #tpu.memory_space<vmem>>, vector<1x32x256xf32>
    %8 = vector.shape_cast %7 : vector<1x32x256xf32> to vector<32x256xf32>
    %9 = vector.shape_cast %6 : vector<32x256xf32> to vector<1x32x256xf32>
    tpu.vector_store %arg5[%c0_6, %c0_7, %c0_8], %9 {strides = array<i32>} : memref<1x32x256xf32, #tpu.memory_space<vmem>>, vector<1x32x256xf32>,
    return
  }
  func.func @transform_0(%arg0: i32, %arg1: i32) -> (i32, i32) {
    %c0_i32 = arith.constant 0 : i32
    %c0_i32_0 = arith.constant 0 : i32
    %c0_i32_1 = arith.constant 0 : i32
    return %c0_i32, %c0_i32_0 : i32, i32
  }
  func.func @transform_1(%arg0: i32, %arg1: i32) -> (i32, i32, i32) {
    %c0_i32 = arith.constant 0 : i32
    %c0_i32_0 = arith.constant 0 : i32
    return %arg0, %c0_i32, %arg1 : i32, i32, i32
  }
  func.func @transform_2(%arg0: i32, %arg1: i32) -> (i32, i32) {
    %c0_i32 = arith.constant 0 : i32
    %c0_i32_0 = arith.constant 0 : i32
    %c0_i32_1 = arith.constant 0 : i32
    return %c0_i32, %c0_i32_0 : i32, i32
  }
  func.func @transform_3(%arg0: i32, %arg1: i32) -> (i32, i32, i32) {
    %c0_i32 = arith.constant 0 : i32
    %c0_i32_0 = arith.constant 0 : i32
    return %arg0, %c0_i32, %arg1 : i32, i32, i32
  }
}

</mosaic_0001>

<bundles_post_ra>
// kernel: tile.0
= control target key start
LH: loop header
LB: loop body
LE: loop exit
PB: predicated region body
PF: predicated region fallthrough
CT: control target
= control target key end

     0   :  { %s66_s8 = smov 125   ;;  %vm7_vm0 = vcmask 7168   ;;  %s67_s11 = smov 126   ;;  %s117_s0 = inlined_call_operand.vmem [shape: f32[4,8], index: 0, kind: input, shape index: {}]   ;;  %s118_s1 = inlined_call_operand.vmem [shape: f32[32,1], index: 1, kind: output, shape index: {}]  }
   0x1   :  { %v4_v0 = vld [vmem:[%s117_s0] sm:$0xf]  ;;  %s65_s0 = smov 127   ;;  %s68_s12 = smov 124  }
   0x2   :  { %5 = vst [vmem:[#allocation0] sm:$0xf] %v4_v0  ;;  %s69_s13 = smov 123   ;;  %s70_s14 = smov 122  }
   0x3   :  { %s71_s15 = smov 121  }
   0x9   :  { %v9_v1 = vld [vmem:[#allocation0] sm:$0xf]  }
   0xa   :  { %v21_v2 = vld [vmem:[#allocation0] sm:$0xf]   ;;  %10 = vrot.lane.b32.xlu0 %v9_v1, %s65_s0 }
   0xb   :  { %22 = vrot.lane.b32.xlu1 %v21_v2, %s66_s8  ;;  %v15_v3 = vld [vmem:[#allocation0] sm:$0xf]  }
   0xc   :  { %v27_v4 = vld [vmem:[#allocation0] sm:$0xf]  }
   0xd   :  { %v6_v5 = vld [vmem:[#allocation0] sm:$0xf]  }
   0xe   :  { %8 = vst.msk [vmem:[%s118_s1] ss:$8 sm:$0xf] %vm7_vm0, %v6_v5   ;;  %16 = vrot.lane.b32.xlu0 %v15_v3, %s67_s11  ;;  %v33_v6 = vld [vmem:[#allocation0] sm:$0xf]  }
   0xf   :  { %28 = vrot.lane.b32.xlu1 %v27_v4, %s68_s12  ;;  %v39_v7 = vld [vmem:[#allocation0] sm:$0xf]  }
  0x10   :  { %v45_v8 = vld [vmem:[#allocation0] sm:$0xf]  }
  0x12   :  { %34 = vrot.lane.b32.xlu0 %v33_v6, %s69_s13 }
  0x13   :  { %40 = vrot.lane.b32.xlu1 %v39_v7, %s70_s14 }
  0x16   :  { %46 = vrot.lane.b32.xlu0 %v45_v8, %s71_s15 }
  0x7c   :  { %v11_v9 = vpop.permute.xlu0 %10  }
  0x7d   :  { %v23_v10 = vpop.permute.xlu1 %22   ;;  %51 = vst.msk [vmem:[%s118_s1 + $0x1] ss:$8 sm:$0xf] %vm7_vm0, %v11_v9  }
  0x7e   :  { %53 = vst.msk [vmem:[%s118_s1 + $0x3] ss:$8 sm:$0xf] %vm7_vm0, %v23_v10  }
  0x80   :  { %v17_v11 = vpop.permute.xlu0 %16  }
  0x81   :  { %v29_v12 = vpop.permute.xlu1 %28   ;;  %52 = vst.msk [vmem:[%s118_s1 + $0x2] ss:$8 sm:$0xf] %vm7_vm0, %v17_v11  }
  0x82   :  { %54 = vst.msk [vmem:[%s118_s1 + $0x4] ss:$8 sm:$0xf] %vm7_vm0, %v29_v12  }
  0x84   :  { %v35_v13 = vpop.permute.xlu0 %34  }
  0x85   :  { %v41_v14 = vpop.permute.xlu1 %40   ;;  %55 = vst.msk [vmem:[%s118_s1 + $0x5] ss:$8 sm:$0xf] %vm7_vm0, %v35_v13  }
  0x86   :  { %56 = vst.msk [vmem:[%s118_s1 + $0x6] ss:$8 sm:$0xf] %vm7_vm0, %v41_v14  }
  0x88   :  { %v47_v15 = vpop.permute.xlu0 %46  }
  0x89   :  { %57 = vst.msk [vmem:[%s118_s1 + $0x7] ss:$8 sm:$0xf] %vm7_vm0, %v47_v15  }

// kernel: tile.8
= control target key start
LH: loop header
LB: loop body
LE: loop exit
PB: predicated region body
PF: predicated region fallthrough
CT: control target
= control target key end

     0   :  { %s22_s0 = inlined_call_operand.vmem [shape: f32[8], index: 0, kind: input, shape index: {}]   ;;  %s23_s1 = inlined_call_operand.vmem [shape: f32[4,8], index: 1, kind: output, shape index: {}]  }
   0x1   :  { %v4_v0 = vld [vmem:[%s22_s0] ss:$0 sm:$0xff] }
   0x2   :  { %5 = vst [vmem:[%s23_s1] sm:$0xf] %v4_v0 }

// kernel: up_forward.1
= control target key start
LH: loop header
LB: loop body
LE: loop exit
PB: predicated region body
PF: predicated region fallthrough
CT: control target
= control target key end

     0   :  { %s539_s12 = smov 0   ;;  %s541_s13 = smov 0   ;;  %s600_s0 = inlined_call_operand.vmem [shape: f32[32,4], index: 0, kind: input, shape index: {}]   ;;  %s601_s1 = inlined_call_operand.vmem [shape: f32[2,4,256], index: 1, kind: input, shape index: {}]   ;;  %s602_s2 = inlined_call_operand.vmem [shape: f32[32,1], index: 2, kind: input, shape index: {}]   ;;  %s603_s3 = inlined_call_operand.vmem [shape: f32[2,32,256], index: 3, kind: output, shape index: {}]  }
   0x1   :  { %s543_s14 = smov 0  }
   0x2 LB: > { %s25_s15 = sadd.s32 1, %s511_s13  ;;  %p447_p0 = scmp.ge.s32.totalorder %s515_s14, 1  ;;  %s515_s14 = sphi %s543_s14, %s13_s14   ;;  %s511_s13 = sphi %s541_s13, %s605_s13   ;;  %s507_s12 = sphi %s539_s12, %s604_s12  }
   0x3   : > { %p27_p1 = scmp.ge.s32.totalorder %s25_s15, 2  ;;  %p158_p2 = scmp.lt.s32.totalorder %s515_s14, 3 }
   0x5   : > { %s607_s15 = smov (%p27_p1, %s25_s15), 0  ;;  %p159_p3 = pnand %p447_p0, %p158_p2 }
   0x6   : > { %p191_p4 = scmp.lt.s32.totalorder (!%p159_p3), %s507_s12, 1  ;;  %v517_v0 = vmov (!%p159_p3), 0.0   ;;  %v217_v1 = vld [vmem:[%s602_s2 + $0x10] sm:$0xff] (!%p159_p3)  ;;  %v518_v2 = vmov (!%p159_p3), 0   ;;  %v215_v3 = vld [vmem:[%s602_s2] sm:$0xff] (!%p159_p3)  ;;  %v218_v4 = vld [vmem:[%s602_s2 + $0x18] sm:$0xff] (!%p159_p3) }
   0x7   : > { %162 = sbr.rel (%p159_p3) target bundleno = 242 (0xf2), region = 32  ;;  %323 = vmatprep.mubr.f32.mxu0 (!%p159_p3), %v517_v0  ;;  %335 = vmatprep.mubr.f32.mxu1 (!%p159_p3), %v517_v0  ;;  %v216_v5 = vld [vmem:[%s602_s2 + $0x8] sm:$0xff] (!%p159_p3)  ;;  %vm254_vm0 = vcmask (!%p159_p3), 1043456   ;;  %v210_v8 = vld [vmem:[%s600_s0] sm:$0xff] (!%p159_p3)  ;;  %vm241_vm1 = vcmask (!%p159_p3), 31744   ;;  %v212_v9 = vld [vmem:[%s600_s0 + $0x10] sm:$0xff] (!%p159_p3) }
   0x8   : > { %491 = vset.pattern.permute.xlu1 (!%p159_p3), %v518_v2  ;;  %490 = vset.pattern.permute.xlu0 (!%p159_p3), %v518_v2  ;;  %v211_v10 = vld [vmem:[%s600_s0 + $0x8] sm:$0xff] (!%p159_p3)  ;;  %v213_v11 = vld [vmem:[%s600_s0 + $0x18] sm:$0xff] (!%p159_p3) }
   0x9   : > { %231 = vperm.xlu1 (!%p159_p3), %491, %v217_v1   ;;  %221 = vperm.xlu0 (!%p159_p3), %490, %v215_v3  }
   0xd   : > { %236 = vperm.xlu1 (!%p159_p3), %491, %v218_v4   ;;  %226 = vperm.xlu0 (!%p159_p3), %490, %v216_v5  }
   0xe   : > { %s609_s12 = smov (!%p191_p4, %s507_s12), 1 }
   0xf   : > { %s460_s20 = sshll.u32 %s609_s12, 3  ;;  %s461_s9 = sshll.u32 %s609_s12, 6 }
  0x10   : > { %s198_s27 = scalar_lea.vmem %s601_s1, %s460_s20  ;;  %s208_s16 = scalar_lea.vmem %s603_s3, %s461_s9 }
  0x11   : > { %v214_v6 = vld [vmem:[%s198_s27] sm:$0xff] }
  0x12   : > { %v240_v7 = vcombine.high %v214_v6, %v214_v6 }
  0x14   : > { %452 = vmatprep.subr.msk.mxu0 %vm254_vm0, %v240_v7  ;;  %462 = vmatprep.subr.msk.mxu1 %vm254_vm0, %v240_v7 }
  0x15   : > { %453 = vmatpush1.msk.msra.mxu0 %vm254_vm0, %v214_v6  ;;  %463 = vmatpush1.msk.msra.mxu1 %vm254_vm0, %v214_v6 }
  0x16   : > { %454 = vmatmul.mubr.msk.f32.vlgmr.msra.gmra.mrb[0].mxu0 %vm241_vm1, %v210_v8  ;;  %456 = vmatmul.mubr.msk.f32.vlgmr.msra.gmra.mrb[0].mxu1 %vm241_vm1, %v212_v9 }
  0x17   : > { %329 = vmatprep.mubr.f32.mxu0 %v517_v0  ;;  %341 = vmatprep.mubr.f32.mxu1 %v517_v0 }
  0x1a   : > { %455 = vmatmul.mubr.msk.f32.gmra.mrb[2].mxu0 %vm241_vm1, %v211_v10  ;;  %457 = vmatmul.mubr.msk.f32.gmra.mrb[2].mxu1 %vm241_vm1, %v213_v11 }
  0x88   : > { %v232_v12 = vpop.permute.xlu1 %231  ;;  %v222_v13 = vpop.permute.xlu0 %221 }
  0x8c   : > { %v237_v22 = vpop.permute.xlu1 %236  ;;  %v227_v23 = vpop.permute.xlu0 %226 }
  0xe9   : > { %v325_v14 = vpop.f32.mrb[0].mxu0  ;;  %v337_v15 = vpop.f32.mrb[0].mxu1 }
  0xea   : > { %v326_v16 = vadd.f32 %v325_v14, %v222_v13  ;;  %v338_v17 = vadd.f32 %v337_v15, %v232_v12  ;;  %v327_v18 = vpop.f32.mrb[1].mxu0  ;;  %v339_v19 = vpop.f32.mrb[1].mxu1 }
  0xeb   : > { %v328_v20 = vadd.f32 %v327_v18, %v222_v13  ;;  %v340_v21 = vadd.f32 %v339_v19, %v232_v12 }
  0xec   : > { %348 = vst [vmem:[%s208_s16] sm:$0xff] %v326_v16  ;;  %352 = vst [vmem:[%s208_s16 + $0x20] sm:$0xff] %v338_v17 }
  0xed   : > { %349 = vst [vmem:[%s208_s16 + $0x8] sm:$0xff] %v328_v20  ;;  %353 = vst [vmem:[%s208_s16 + $0x28] sm:$0xff] %v340_v21  ;;  %v331_v24 = vpop.f32.mrb[2].mxu0  ;;  %v343_v25 = vpop.f32.mrb[2].mxu1 }
  0xee   : > { %v332_v26 = vadd.f32 %v331_v24, %v227_v23  ;;  %v344_v27 = vadd.f32 %v343_v25, %v237_v22  ;;  %v333_v28 = vpop.f32.mrb[3].mxu0  ;;  %v345_v29 = vpop.f32.mrb[3].mxu1 }
  0xef   : > { %v334_v30 = vadd.f32 %v333_v28, %v227_v23  ;;  %v346_v31 = vadd.f32 %v345_v29, %v237_v22 }
  0xf0   : > { %350 = vst [vmem:[%s208_s16 + $0x10] sm:$0xff] %v332_v26  ;;  %354 = vst [vmem:[%s208_s16 + $0x30] sm:$0xff] %v344_v27 }
  0xf1   : > { %351 = vst [vmem:[%s208_s16 + $0x18] sm:$0xff] %v334_v30  ;;  %355 = vst [vmem:[%s208_s16 + $0x38] sm:$0xff] %v346_v31 }
  0xf2 PF: > { %s13_s14 = sadd.s32 1, %s515_s14   ;;  %s604_s12 = smov %s511_s13 }
  0xf3   : > { %p10_p5 = scmp.ge.s32.totalorder %s13_s14, 4   ;;  %s605_s13 = smov %s607_s15 }
  0xf5   :  { %12 = sbr.rel (!%p10_p5) target bundleno = 2 (0x2), region = 62 }

</bundles_post_ra>
